<compile_context>
chip_gen: v7x
topology: tpu7x:2x2x1
jax: 0.10.0
libtpu: 0.0.40
codegen_flags: <defaults>
</compile_context>

<pallas_src>
import jax
import jax.numpy as jnp
from jax.experimental import pallas as pl
from jax.experimental.pallas import tpu as pltpu


def _round_up(x, m):
    return ((x + m - 1) // m) * m


def _linear_kernel(x_ref, wt_ref, b_ref, o_ref):
    # x_ref: [TB, D], wt_ref: [D, OUT], b_ref: [1, OUT], o_ref: [TB, OUT]
    acc = jnp.dot(x_ref[...], wt_ref[...], preferred_element_type=jnp.float32)
    o_ref[...] = (acc + b_ref[...]).astype(o_ref.dtype)


def logistic_regression_forward(x, weight, bias, *, max_tb=4096, use_pallas=None):
    """out = x @ weight.T + bias  (matches nn.Linear(input_size, 2).forward).

    x:      [B, D]
    weight: [OUT, D]
    bias:   [OUT]
    """
    B, D = x.shape
    OUT, D2 = weight.shape
    assert D == D2, "weight/input feature mismatch"

    # One-time tiny parameter prep (outside the kernel): pre-transposed weight
    # so the kernel is a plain row-major MXU dot, bias as a broadcastable row.
    wt = weight.T.astype(x.dtype)                 # (D, OUT), resident in VMEM
    b2 = bias.astype(x.dtype).reshape(1, OUT)     # (1, OUT)

    # Small-batch fast path: pallas_call launch / grid bookkeeping dominates for
    # tiny B; XLA fuses the trivial GEMV far more cheaply.
    if use_pallas is None:
        use_pallas = B >= 1024
    if not use_pallas:
        return x @ wt + b2

    # ---- batch tiling -------------------------------------------------------
    # TB: as many rows as allowed (big DMAs -> better HBM efficiency), but when
    # the batch is large keep >= 2 grid steps so v7x's two TensorCores both get
    # work via the "parallel" batch axis.  TB is a multiple of 8 (f32 sublanes).
    n_rows = _round_up(B, 8)
    TB = min(max_tb, n_rows)
    if TB == n_rows and B >= 2048:
        TB = min(max_tb, _round_up(-(-B // 2), 8))

    grid = (pl.cdiv(B, TB),)  # last block may be partial: reads are padded,
                              # out-of-bounds writes are masked off by Pallas.

    # VMEM footprint (worst case TB=4096, f32): x 0.5 MiB x2 bufs + out
    # (lane-padded in VMEM) 2 MiB x2 bufs + tiny resident W/b  ~= 5 MiB,
    # well inside the scoped-VMEM default on v5e/v6e/v7x.
    out = pl.pallas_call(
        _linear_kernel,
        out_shape=jax.ShapeDtypeStruct((B, OUT), x.dtype),
        grid_spec=pltpu.PrefetchScalarGridSpec(
            num_scalar_prefetch=0,
            grid=grid,
            in_specs=[
                # streamed input: one batch tile per grid step (double-buffered)
                pl.BlockSpec((TB, D), lambda i: (i, 0)),
                # weight / bias stay resident across the whole grid
                pl.BlockSpec((D, OUT), lambda i: (0, 0)),
                pl.BlockSpec((1, OUT), lambda i: (0, 0)),
            ],
            # OUT is the full minor dim of the array -> legal BlockSpec; the
            # masked 2-lane store is cheap and output HBM traffic is minimal.
            out_specs=pl.BlockSpec((TB, OUT), lambda i: (i, 0)),
        ),
        compiler_params=pltpu.CompilerParams(
            # batch rows are independent -> shardable across TensorCores (v7x)
            dimension_semantics=("parallel",),
        ),
    )(x, wt, b2)
    return out


if __name__ == "__main__":
    # Small shapes consistent with the module: batch=8, input_size=32, 2 classes.
    B, D, OUT = 8, 32, 2
    key = jax.random.PRNGKey(0)
    kx, kw, kb, kx2 = jax.random.split(key, 4)

    # Deterministic init mimicking nn.Linear's uniform(-1/sqrt(D), 1/sqrt(D)).
    bound = 1.0 / jnp.sqrt(jnp.float32(D))
    x = jax.random.normal(kx, (B, D), dtype=jnp.float32)
    weight = jax.random.uniform(kw, (OUT, D), dtype=jnp.float32, minval=-bound, maxval=bound)
    bias = jax.random.uniform(kb, (OUT,), dtype=jnp.float32, minval=-bound, maxval=bound)

    # Force the Pallas path so the kernel actually runs at demo size
    # (the auto heuristic would use the small-batch XLA fast path here).
    out = logistic_regression_forward(x, weight, bias, use_pallas=True)
    out = jax.block_until_ready(out)

    ref = x @ weight.T + bias
    assert out.shape == (B, OUT)
    assert jnp.allclose(out, ref, atol=1e-5, rtol=1e-5), "mismatch vs reference (B=8)"

    # Uneven, multi-tile batch: exercises the padless edge-block masking path.
    B2 = 300
    x2 = jax.random.normal(kx2, (B2, D), dtype=jnp.float32)
    out2 = jax.block_until_ready(
        logistic_regression_forward(x2, weight, bias, use_pallas=True, max_tb=128)
    )
    ref2 = x2 @ weight.T + bias
    assert out2.shape == (B2, OUT)
    assert jnp.allclose(out2, ref2, atol=1e-5, rtol=1e-5), "mismatch vs reference (B=300)"

    print("KERNEL_OK")
</pallas_src>

<mosaic_0001>
module attributes {stable_mosaic.version = 11 : i64} {
  func.func @_linear_kernel(%arg0: i32, %arg1: memref<8x32xf32, #tpu.memory_space<vmem>>, %arg2: memref<32x2xf32, #tpu.memory_space<vmem>>, %arg3: memref<1x2xf32, #tpu.memory_space<vmem>>, %arg4: memref<8x2xf32, #tpu.memory_space<vmem>>) attributes {dimension_semantics = [#tpu.dimension_semantics<parallel>], iteration_bounds = array<i64: 1>, scalar_prefetch = 0 : i64, scratch_operands = 0 : i64, tpu.core_type = #tpu.core_type<tc>, window_params = [{transform_indices = @transform_0, window_bounds = array<i64: 8, 32>}, {pipeline_mode = #tpu.pipeline_mode<synchronous>, transform_indices = @transform_1, window_bounds = array<i64: 32, 2>}, {pipeline_mode = #tpu.pipeline_mode<synchronous>, transform_indices = @transform_2, window_bounds = array<i64: 1, 2>}, {transform_indices = @transform_3, window_bounds = array<i64: 8, 2>}]} {
    %c0 = arith.constant 0 : index
    %c0_0 = arith.constant 0 : index
    %0 = vector.load %arg1[%c0, %c0_0] : memref<8x32xf32, #tpu.memory_space<vmem>>, vector<8x32xf32>
    %c0_1 = arith.constant 0 : index
    %c0_2 = arith.constant 0 : index
    %1 = vector.load %arg2[%c0_1, %c0_2] : memref<32x2xf32, #tpu.memory_space<vmem>>, vector<32x2xf32>
    %cst = arith.constant dense<0.000000e+00> : vector<8x2xf32>
    %2 = tpu.matmul %0, %1, %cst {dimension_numbers = #tpu.dot_dimension_numbers<[1], [0], [0], [1], [0, 0, 1, 1], [], []>} : vector<8x32xf32>, vector<32x2xf32>, vector<8x2xf32> -> vector<8x2xf32>
    %c0_3 = arith.constant 0 : index
    %c0_4 = arith.constant 0 : index
    %3 = vector.load %arg3[%c0_3, %c0_4] : memref<1x2xf32, #tpu.memory_space<vmem>>, vector<1x2xf32>
    %4 = vector.broadcast %3 : vector<1x2xf32> to vector<8x2xf32>
    %5 = arith.addf %2, %4 : vector<8x2xf32>
    %c0_5 = arith.constant 0 : index
    %c0_6 = arith.constant 0 : index
    %6 = vector.load %arg4[%c0_5, %c0_6] : memref<8x2xf32, #tpu.memory_space<vmem>>, vector<8x2xf32>
    tpu.vector_store %arg4[%c0_5, %c0_6], %5 {strides = array<i32>} : memref<8x2xf32, #tpu.memory_space<vmem>>, vector<8x2xf32>,
    return
  }
  func.func @transform_0(%arg0: i32) -> (i32, i32) {
    %c0_i32 = arith.constant 0 : i32
    %c0_i32_0 = arith.constant 0 : i32
    return %arg0, %c0_i32 : i32, i32
  }
  func.func @transform_1(%arg0: i32) -> (i32, i32) {
    %c0_i32 = arith.constant 0 : i32
    %c0_i32_0 = arith.constant 0 : i32
    %c0_i32_1 = arith.constant 0 : i32
    return %c0_i32, %c0_i32_0 : i32, i32
  }
  func.func @transform_2(%arg0: i32) -> (i32, i32) {
    %c0_i32 = arith.constant 0 : i32
    %c0_i32_0 = arith.constant 0 : i32
    %c0_i32_1 = arith.constant 0 : i32
    return %c0_i32, %c0_i32_0 : i32, i32
  }
  func.func @transform_3(%arg0: i32) -> (i32, i32) {
    %c0_i32 = arith.constant 0 : i32
    %c0_i32_0 = arith.constant 0 : i32
    return %arg0, %c0_i32 : i32, i32
  }
}

</mosaic_0001>

<bundles_post_ra>
// kernel: tpu_custom_call.1
= control target key start
LH: loop header
LB: loop body
LE: loop exit
PB: predicated region body
PF: predicated region fallthrough
CT: control target
= control target key end

     0   :  { %v133_v0 = vmov 0.0|0.0   ;;  %vm134_vm0 = vmmov 0   ;;  %v135_v4 = vmov 0.0   ;;  %vm26_vm1 = vcmask 261120   ;;  %s177_s1 = inlined_call_operand.vmem [shape: f32[32,2], index: 1, kind: input, shape index: {}]   ;;  %s178_s0 = inlined_call_operand.vmem [shape: f32[8,32], index: 0, kind: input, shape index: {}]   ;;  %s179_s2 = inlined_call_operand.vmem [shape: f32[1,2], index: 2, kind: input, shape index: {}]   ;;  %s180_s3 = inlined_call_operand.vmem [shape: f32[8,2], index: 3, kind: output, shape index: {}]  }
   0x1   :  { %124 = vmatprep.subr.bf16.mxu0 %v133_v0  ;;  %v15_v1 = vld [vmem:[%s177_s1] sm:$0xff]  ;;  %v16_v2 = vld [vmem:[%s177_s1 + $0x8] sm:$0xff]  ;;  %v17_v3 = vld [vmem:[%s177_s1 + $0x10] sm:$0xff]  ;;  %121 = vmatprep.mubr.msk.f32.mxu0 %vm134_vm0, %v135_v4  ;;  %vm100_vm2 = vcmask 15360  }
   0x2   :  { %v125_v5 = vpack.c.bf16 %v16_v2, %v15_v1  ;;  %v18_v6 = vld [vmem:[%s177_s1 + $0x18] sm:$0xff]  ;;  %v14_v8 = vld [vmem:[%s178_s0] sm:$0xff] }
   0x3   :  { %v128_v7 = vpack.c.bf16 %v18_v6, %v17_v3  ;;  %v106_v9 = vld [vmem:[%s179_s2] ss:$0 sm:$0xff] }
   0x4   :  { %126 = vmatpush3.bf16.msra.mxu0 %v125_v5 }
   0x5   :  { %127 = vmatprep.subr.bf16.mxu0 %v133_v0 }
   0x8   :  { %129 = vmatpush3.bf16.msra.mxu0 %v128_v7 }
   0xb   :  { %122 = vmatmul.mubr.msk.f32.vlgmr.msra.gmra.mrb[0].mxu0 %vm26_vm1, %v14_v8 }
  0xde   :  { %v96_v10 = vpop.f32.mrb[0].mxu0 }
  0xdf   :  { %v97_v11 = vadd.f32 %v106_v9, %v96_v10  ;;  %v123_v12 = vpop.f32.mrb[1].mxu0 }
  0xe1   :  { %101 = vst.msk [vmem:[%s180_s3] sm:$0xff] %vm100_vm2, %v97_v11 }

</bundles_post_ra>
